<compile_context>
chip_gen: v7x
topology: tpu7x:2x2x1
jax: 0.10.0
libtpu: 0.0.40
codegen_flags: <defaults>
</compile_context>

<pallas_src>
import functools

import jax
import jax.numpy as jnp
from jax.experimental import pallas as pl
from jax.experimental.pallas import tpu as pltpu

NUM_CLASSES = 9      # module default
LOSS_WEIGHT = 1.0
_SMOOTH = 1.0
_EPS = 1e-8          # F.cosine_similarity default eps
_LANE = 128
# Budget for the double-buffered (student + teacher + mask) input blocks,
# computed with sublane-tile padding.  8 MiB leaves headroom under v5e's
# 16 MiB default scoped-VMEM limit (v6e/v7x defaults are 32 MiB).
_VMEM_INPUT_BUDGET = 8 * 1024 * 1024


# ----------------------------- Pallas kernel ------------------------------ #
def _rad_kernel(cnt_ref, xs_ref, xt_ref, m_ref, out_ref,
                acc_s_ref, acc_t_ref, cs_s_ref, cs_t_ref,
                *, vt, v_true, ragged, mat_dtype):
    """Grid = (batch, voxel-tile).

    cnt_ref : (1, NC)  f32  per-class foreground count (host-computed).
    xs_ref  : (C, vt)  student logits tile.
    xt_ref  : (C, vt)  teacher logits tile.
    m_ref   : (NC, vt) int8 per-class foreground mask tile (0/1).
    out_ref : (1, NC)  per-batch squared cosine-difference (lane-dense).
    acc_*   : (C, NC)  f32  sum_v x[c, v] * mask[i, v]   (region0 sums).
    cs_*    : (C, 1)   f32  sum_v x[c, v]                (column sums).
    """
    v = pl.program_id(1)

    @pl.when(v == 0)
    def _():
        acc_s_ref[...] = jnp.zeros_like(acc_s_ref)
        acc_t_ref[...] = jnp.zeros_like(acc_t_ref)
        cs_s_ref[...] = jnp.zeros_like(cs_s_ref)
        cs_t_ref[...] = jnp.zeros_like(cs_t_ref)

    xs = xs_ref[...]                         # (C, vt), input float dtype
    xt = xt_ref[...]
    if ragged:
        # Pallas does NOT zero out-of-bounds block contents; zero the lanes
        # past the true voxel count.  Only the x operands need it: the int8
        # mask tail is garbage but finite, so 0 * mask contributes 0 exactly.
        lane = jax.lax.broadcasted_iota(jnp.int32, xs.shape, 1)
        keep = lane < (v_true - v * vt)
        xs = jnp.where(keep, xs, 0)
        xt = jnp.where(keep, xt, 0)

    # Mask cast to the matmul dtype (bf16 by default: products against a 0/1
    # mask are exact, accumulation is f32 in the MXU; avoids f32x f32 MXU
    # emulation).  Operand order dot(x, m) contracts both minor axes so any
    # layout/transpose hit lands on the narrow low-precision mask operand,
    # never on the wide x tile.
    m = m_ref[...].astype(mat_dtype)         # (NC, vt), exact 0/1
    dims = (((1,), (1,)), ((), ()))
    acc_s_ref[...] += jax.lax.dot_general(
        xs.astype(mat_dtype), m, dims, preferred_element_type=jnp.float32)
    acc_t_ref[...] += jax.lax.dot_general(
        xt.astype(mat_dtype), m, dims, preferred_element_type=jnp.float32)

    # Per-channel column sums: cheap lane reduction, keeps f32 accuracy.
    cs_s_ref[...] += jnp.sum(xs.astype(jnp.float32), axis=-1, keepdims=True)
    cs_t_ref[...] += jnp.sum(xt.astype(jnp.float32), axis=-1, keepdims=True)

    @pl.when(v == pl.num_programs(1) - 1)
    def _():
        cnt = cnt_ref[...]                                 # (1, NC) sum(mask0)
        denom = (jnp.float32(v_true) - cnt) + _SMOOTH      # sum(mask1)+smooth

        def cosine(r0, r1):
            # F.cosine_similarity over the channel axis (per-vector eps clamp).
            w12 = jnp.sum(r0 * r1, axis=0, keepdims=True)
            n0 = jnp.sqrt(jnp.sum(r0 * r0, axis=0, keepdims=True))
            n1 = jnp.sqrt(jnp.sum(r1 * r1, axis=0, keepdims=True))
            return w12 / (jnp.maximum(n0, _EPS) * jnp.maximum(n1, _EPS))

        acc_s = acc_s_ref[...]                             # (C, NC)
        acc_t = acc_t_ref[...]
        r0s = acc_s / denom
        r1s = (cs_s_ref[...] - acc_s) / denom              # mask1 eliminated
        r0t = acc_t / denom
        r1t = (cs_t_ref[...] - acc_t) / denom

        d = cosine(r0s, r1s) - cosine(r0t, r1t)            # (1, NC)
        out_ref[...] = d * d


# ------------------------------- JAX glue ---------------------------------- #
def _interpolate_nearest_3d(x, out_size):
    """F.interpolate(x, size, mode='nearest') for NCDHW tensors (any dtype)."""
    Do, Ho, Wo = out_size
    Di, Hi, Wi = x.shape[2:]
    di = jnp.minimum((jnp.arange(Do) * Di) // Do, Di - 1)
    hi = jnp.minimum((jnp.arange(Ho) * Hi) // Ho, Hi - 1)
    wi = jnp.minimum((jnp.arange(Wo) * Wi) // Wo, Wi - 1)
    return x[:, :, di][:, :, :, hi][:, :, :, :, wi]


def _padded_lane_bytes(rows, dtype):
    """Bytes per lane of a (rows, vt) VMEM block, with sublane-tile padding."""
    itemsize = jnp.dtype(dtype).itemsize
    granule = max(1, 32 // itemsize)          # f32 -> 8, bf16 -> 16, int8 -> 32
    return pl.cdiv(rows, granule) * granule * itemsize


def rad_brats23_loss(logits_s, logits_t, ground_truth,
                     num_classes=NUM_CLASSES, loss_weight=LOSS_WEIGHT,
                     matmul_dtype=jnp.bfloat16, max_voxel_tile=None):
    """Region affinity distillation loss (RAD_BraTS23 forward).

    matmul_dtype: dtype of the in-kernel MXU products (bf16 default; pass
                  jnp.float32 for bit-accurate f32 region sums).
    max_voxel_tile: optional override of the voxel tile size (testing).
    """
    B, C, D, H, W = logits_s.shape
    V = D * H * W

    # ---- ground truth path: stays narrow (bool / int8) end to end ---------
    gt = ground_truth[:, :num_classes]
    fg = gt != 0                      # (!=0) commutes with the nearest resize
    if tuple(gt.shape[2:]) != (D, H, W):
        fg = _interpolate_nearest_3d(fg, (D, H, W))
    fg = fg.reshape(B, num_classes, V).astype(jnp.int8)

    # Per-(batch, class) foreground count: tiny, and XLA can fuse the reduce
    # into the fusion that produces fg.
    cnt = jnp.sum(fg, axis=-1, dtype=jnp.float32).reshape(B, 1, num_classes)

    # ---- logits: contiguous reshapes only (no concatenate / pad copies) ----
    xs = logits_s.reshape(B, C, V)
    xt = logits_t.reshape(B, C, V)
    if not jnp.issubdtype(xs.dtype, jnp.floating):
        xs = xs.astype(jnp.float32)
        xt = xt.astype(jnp.float32)

    # ---- voxel-axis tiling (sublane-padding-aware VMEM accounting) --------
    per_lane = 2 * _padded_lane_bytes(C, xs.dtype) \
        + _padded_lane_bytes(num_classes, jnp.int8)
    max_vt = max(_LANE,
                 (_VMEM_INPUT_BUDGET // (2 * per_lane)) // _LANE * _LANE)
    if max_voxel_tile is not None:
        max_vt = max(_LANE, (int(max_voxel_tile) // _LANE) * _LANE)

    if V <= max_vt:
        vt, n_vt, ragged = V, 1, False
    else:
        n_tiles = pl.cdiv(V, max_vt)
        vt = pl.cdiv(pl.cdiv(V, n_tiles), _LANE) * _LANE
        n_vt = pl.cdiv(V, vt)
        ragged = (n_vt * vt) != V      # last tile masked in-kernel (no jnp.pad)

    kernel = functools.partial(_rad_kernel, vt=vt, v_true=V, ragged=ragged,
                               mat_dtype=matmul_dtype)

    d2 = pl.pallas_call(
        kernel,
        out_shape=jax.ShapeDtypeStruct((B, 1, num_classes), jnp.float32),
        grid_spec=pltpu.PrefetchScalarGridSpec(
            num_scalar_prefetch=0,
            grid=(B, n_vt),
            in_specs=[
                pl.BlockSpec((pl.Squeezed(), 1, num_classes),
                             lambda b, v: (b, 0, 0)),
                pl.BlockSpec((pl.Squeezed(), C, vt), lambda b, v: (b, 0, v)),
                pl.BlockSpec((pl.Squeezed(), C, vt), lambda b, v: (b, 0, v)),
                pl.BlockSpec((pl.Squeezed(), num_classes, vt),
                             lambda b, v: (b, 0, v)),
            ],
            out_specs=pl.BlockSpec((pl.Squeezed(), 1, num_classes),
                                   lambda b, v: (b, 0, 0)),
            scratch_shapes=[
                pltpu.VMEM((C, num_classes), jnp.float32),   # acc_s
                pltpu.VMEM((C, num_classes), jnp.float32),   # acc_t
                pltpu.VMEM((C, 1), jnp.float32),             # colsum_s
                pltpu.VMEM((C, 1), jnp.float32),             # colsum_t
            ],
        ),
        compiler_params=pltpu.CompilerParams(
            dimension_semantics=("parallel", "arbitrary")),
    )(cnt, xs, xt, fg)

    # loss = (1/NC) * sum_i mean_b d_i(b)^2 == mean over (b, i)
    return loss_weight * jnp.mean(d2)


# --------------------------- pure-JAX reference ---------------------------- #
def _reference(logits_s, logits_t, ground_truth,
               num_classes=NUM_CLASSES, loss_weight=LOSS_WEIGHT):
    B, C, D, H, W = logits_s.shape
    gt = _interpolate_nearest_3d(ground_truth.astype(jnp.float32), (D, H, W))
    xs = logits_s.astype(jnp.float32)
    xt = logits_t.astype(jnp.float32)

    def region_contrast(x, g1):          # g1: (B, 1, D, H, W)
        mask0 = (g1 != 0).astype(jnp.float32)
        mask1 = 1.0 - mask0
        den = jnp.sum(mask1, axis=(2, 3, 4)) + _SMOOTH
        r0 = jnp.sum(x * mask0, axis=(2, 3, 4)) / den
        r1 = jnp.sum(x * mask1, axis=(2, 3, 4)) / den
        w12 = jnp.sum(r0 * r1, axis=1)
        n0 = jnp.sqrt(jnp.sum(r0 * r0, axis=1))
        n1 = jnp.sqrt(jnp.sum(r1 * r1, axis=1))
        return w12 / (jnp.maximum(n0, _EPS) * jnp.maximum(n1, _EPS))

    loss = 0.0
    for i in range(num_classes):
        gi = gt[:, i:i + 1]
        loss = loss + jnp.mean(
            (region_contrast(xs, gi) - region_contrast(xt, gi)) ** 2)
    return loss_weight * loss / num_classes


# ---------------------------------- main ----------------------------------- #
if __name__ == "__main__":
    key = jax.random.PRNGKey(0)
    k1, k2, k3, k4, k5, k6 = jax.random.split(key, 6)

    # ---- case 1: gt at 2x resolution (exercises the nearest resize) -------
    B, C = 2, 4
    D = H = W = 8          # student/teacher spatial size  (V = 512)
    Dg = Hg = Wg = 16      # ground-truth spatial size

    logits_S = jax.random.normal(k1, (B, C, D, H, W), jnp.float32)
    logits_T = jax.random.normal(k2, (B, C, D, H, W), jnp.float32)
    ground_truth = jax.random.randint(k3, (B, NUM_CLASSES, Dg, Hg, Wg), 0, 2,
                                      dtype=jnp.int32)
    ref = _reference(logits_S, logits_T, ground_truth)

    # exact f32 matmul path (bit-accurate semantics of the PyTorch module)
    loss_f32 = jax.jit(functools.partial(
        rad_brats23_loss, matmul_dtype=jnp.float32))(
            logits_S, logits_T, ground_truth)
    loss_f32 = jax.block_until_ready(loss_f32)
    if not jnp.allclose(loss_f32, ref, rtol=1e-4, atol=1e-5):
        raise AssertionError(f"f32 Pallas result {loss_f32} != reference {ref}")

    # default bf16-matmul path (f32 MXU accumulation), looser tolerance
    loss_bf16 = jax.jit(rad_brats23_loss)(logits_S, logits_T, ground_truth)
    loss_bf16 = jax.block_until_ready(loss_bf16)
    if not jnp.allclose(loss_bf16, ref, rtol=5e-2, atol=1e-2):
        raise AssertionError(f"bf16 Pallas result {loss_bf16} != reference {ref}")

    # ---- case 2: tiled + ragged voxel axis, gt already at student size ----
    D2, H2, W2 = 7, 8, 9   # V = 504, tile = 256 -> 2 tiles, last one ragged
    logits_S2 = jax.random.normal(k4, (B, C, D2, H2, W2), jnp.float32)
    logits_T2 = jax.random.normal(k5, (B, C, D2, H2, W2), jnp.float32)
    ground_truth2 = jax.random.randint(k6, (B, NUM_CLASSES, D2, H2, W2), 0, 3,
                                       dtype=jnp.int32)
    ref2 = _reference(logits_S2, logits_T2, ground_truth2)

    loss2 = jax.jit(functools.partial(
        rad_brats23_loss, matmul_dtype=jnp.float32, max_voxel_tile=256))(
            logits_S2, logits_T2, ground_truth2)
    loss2 = jax.block_until_ready(loss2)
    if not jnp.allclose(loss2, ref2, rtol=1e-4, atol=1e-5):
        raise AssertionError(f"ragged Pallas result {loss2} != reference {ref2}")

    print("KERNEL_OK")
</pallas_src>

<mosaic_0001>
module attributes {stable_mosaic.version = 11 : i64} {
  func.func @_rad_kernel(%arg0: i32, %arg1: i32, %arg2: memref<1x1x9xf32, #tpu.memory_space<vmem>>, %arg3: memref<1x4x512xf32, #tpu.memory_space<vmem>>, %arg4: memref<1x4x512xf32, #tpu.memory_space<vmem>>, %arg5: memref<1x9x512xi8, #tpu.memory_space<vmem>>, %arg6: memref<1x1x9xf32, #tpu.memory_space<vmem>>, %arg7: memref<4x9xf32, #tpu.memory_space<vmem>>, %arg8: memref<4x9xf32, #tpu.memory_space<vmem>>, %arg9: memref<4x1xf32, #tpu.memory_space<vmem>>, %arg10: memref<4x1xf32, #tpu.memory_space<vmem>>) attributes {dimension_semantics = [#tpu.dimension_semantics<parallel>, #tpu.dimension_semantics<arbitrary>], iteration_bounds = array<i64: 2, 1>, scalar_prefetch = 0 : i64, scratch_operands = 4 : i64, tpu.core_type = #tpu.core_type<tc>, window_params = [{transform_indices = @transform_0, window_bounds = array<i64: 1, 1, 9>}, {transform_indices = @transform_1, window_bounds = array<i64: 1, 4, 512>}, {transform_indices = @transform_2, window_bounds = array<i64: 1, 4, 512>}, {transform_indices = @transform_3, window_bounds = array<i64: 1, 9, 512>}, {transform_indices = @transform_4, window_bounds = array<i64: 1, 1, 9>}]} {
    %c0_i32 = arith.constant 0 : i32
    %0 = arith.cmpi eq, %arg1, %c0_i32 : i32
    %1 = arith.extui %0 : i1 to i32
    %c0_i32_0 = arith.constant 0 : i32
    %2 = arith.cmpi ne, %1, %c0_i32_0 : i32
    scf.if %2 {
      %cst_30 = arith.constant 0.000000e+00 : f32
      %31 = vector.broadcast %cst_30 : f32 to vector<4x9xf32>
      %c0_31 = arith.constant 0 : index
      %c0_32 = arith.constant 0 : index
      %32 = vector.load %arg7[%c0_31, %c0_32] : memref<4x9xf32, #tpu.memory_space<vmem>>, vector<4x9xf32>
      tpu.vector_store %arg7[%c0_31, %c0_32], %31 {strides = array<i32>} : memref<4x9xf32, #tpu.memory_space<vmem>>, vector<4x9xf32>,
      %cst_33 = arith.constant 0.000000e+00 : f32
      %33 = vector.broadcast %cst_33 : f32 to vector<4x9xf32>
      %c0_34 = arith.constant 0 : index
      %c0_35 = arith.constant 0 : index
      %34 = vector.load %arg8[%c0_34, %c0_35] : memref<4x9xf32, #tpu.memory_space<vmem>>, vector<4x9xf32>
      tpu.vector_store %arg8[%c0_34, %c0_35], %33 {strides = array<i32>} : memref<4x9xf32, #tpu.memory_space<vmem>>, vector<4x9xf32>,
      %cst_36 = arith.constant 0.000000e+00 : f32
      %35 = vector.broadcast %cst_36 : f32 to vector<4x1xf32>
      %c0_37 = arith.constant 0 : index
      %c0_38 = arith.constant 0 : index
      %36 = vector.load %arg9[%c0_37, %c0_38] : memref<4x1xf32, #tpu.memory_space<vmem>>, vector<4x1xf32>
      tpu.vector_store %arg9[%c0_37, %c0_38], %35 {strides = array<i32>} : memref<4x1xf32, #tpu.memory_space<vmem>>, vector<4x1xf32>,
      %cst_39 = arith.constant 0.000000e+00 : f32
      %37 = vector.broadcast %cst_39 : f32 to vector<4x1xf32>
      %c0_40 = arith.constant 0 : index
      %c0_41 = arith.constant 0 : index
      %38 = vector.load %arg10[%c0_40, %c0_41] : memref<4x1xf32, #tpu.memory_space<vmem>>, vector<4x1xf32>
      tpu.vector_store %arg10[%c0_40, %c0_41], %37 {strides = array<i32>} : memref<4x1xf32, #tpu.memory_space<vmem>>, vector<4x1xf32>,
    } else {
    }
    %c0 = arith.constant 0 : index
    %c0_1 = arith.constant 0 : index
    %c0_2 = arith.constant 0 : index
    %3 = vector.load %arg3[%c0, %c0_1, %c0_2] : memref<1x4x512xf32, #tpu.memory_space<vmem>>, vector<1x4x512xf32>
    %4 = vector.shape_cast %3 : vector<1x4x512xf32> to vector<4x512xf32>
    %c0_3 = arith.constant 0 : index
    %c0_4 = arith.constant 0 : index
    %c0_5 = arith.constant 0 : index
    %5 = vector.load %arg4[%c0_3, %c0_4, %c0_5] : memref<1x4x512xf32, #tpu.memory_space<vmem>>, vector<1x4x512xf32>
    %6 = vector.shape_cast %5 : vector<1x4x512xf32> to vector<4x512xf32>
    %c0_6 = arith.constant 0 : index
    %c0_7 = arith.constant 0 : index
    %c0_8 = arith.constant 0 : index
    %7 = vector.load %arg5[%c0_6, %c0_7, %c0_8] : memref<1x9x512xi8, #tpu.memory_space<vmem>>, vector<1x9x512xi8>
    %8 = vector.shape_cast %7 : vector<1x9x512xi8> to vector<9x512xi8>
    %9 = arith.sitofp %8 : vector<9x512xi8> to vector<9x512xf32>
    %c0_9 = arith.constant 0 : index
    %c0_10 = arith.constant 0 : index
    %10 = vector.load %arg7[%c0_9, %c0_10] : memref<4x9xf32, #tpu.memory_space<vmem>>, vector<4x9xf32>
    %cst = arith.constant dense<0.000000e+00> : vector<4x9xf32>
    %11 = tpu.matmul %4, %9, %cst {dimension_numbers = #tpu.dot_dimension_numbers<[1], [1], [0], [0], [0, 0, 1, 0], [], []>} : vector<4x512xf32>, vector<9x512xf32>, vector<4x9xf32> -> vector<4x9xf32>
    %12 = arith.addf %10, %11 : vector<4x9xf32>
    %c0_11 = arith.constant 0 : index
    %c0_12 = arith.constant 0 : index
    %13 = vector.load %arg7[%c0_11, %c0_12] : memref<4x9xf32, #tpu.memory_space<vmem>>, vector<4x9xf32>
    tpu.vector_store %arg7[%c0_11, %c0_12], %12 {strides = array<i32>} : memref<4x9xf32, #tpu.memory_space<vmem>>, vector<4x9xf32>,
    %c0_13 = arith.constant 0 : index
    %c0_14 = arith.constant 0 : index
    %14 = vector.load %arg8[%c0_13, %c0_14] : memref<4x9xf32, #tpu.memory_space<vmem>>, vector<4x9xf32>
    %cst_15 = arith.constant dense<0.000000e+00> : vector<4x9xf32>
    %15 = tpu.matmul %6, %9, %cst_15 {dimension_numbers = #tpu.dot_dimension_numbers<[1], [1], [0], [0], [0, 0, 1, 0], [], []>} : vector<4x512xf32>, vector<9x512xf32>, vector<4x9xf32> -> vector<4x9xf32>
    %16 = arith.addf %14, %15 : vector<4x9xf32>
    %c0_16 = arith.constant 0 : index
    %c0_17 = arith.constant 0 : index
    %17 = vector.load %arg8[%c0_16, %c0_17] : memref<4x9xf32, #tpu.memory_space<vmem>>, vector<4x9xf32>
    tpu.vector_store %arg8[%c0_16, %c0_17], %16 {strides = array<i32>} : memref<4x9xf32, #tpu.memory_space<vmem>>, vector<4x9xf32>,
    %c0_18 = arith.constant 0 : index
    %c0_19 = arith.constant 0 : index
    %18 = vector.load %arg9[%c0_18, %c0_19] : memref<4x1xf32, #tpu.memory_space<vmem>>, vector<4x1xf32>
    %cst_20 = arith.constant dense<0.000000e+00> : vector<4xf32>
    %19 = vector.multi_reduction <add>, %4, %cst_20 [1] : vector<4x512xf32> to vector<4xf32>
    %20 = vector.shape_cast %19 : vector<4xf32> to vector<4x1xf32>
    %21 = arith.addf %18, %20 : vector<4x1xf32>
    %c0_21 = arith.constant 0 : index
    %c0_22 = arith.constant 0 : index
    %22 = vector.load %arg9[%c0_21, %c0_22] : memref<4x1xf32, #tpu.memory_space<vmem>>, vector<4x1xf32>
    tpu.vector_store %arg9[%c0_21, %c0_22], %21 {strides = array<i32>} : memref<4x1xf32, #tpu.memory_space<vmem>>, vector<4x1xf32>,
    %c0_23 = arith.constant 0 : index
    %c0_24 = arith.constant 0 : index
    %23 = vector.load %arg10[%c0_23, %c0_24] : memref<4x1xf32, #tpu.memory_space<vmem>>, vector<4x1xf32>
    %cst_25 = arith.constant dense<0.000000e+00> : vector<4xf32>
    %24 = vector.multi_reduction <add>, %6, %cst_25 [1] : vector<4x512xf32> to vector<4xf32>
    %25 = vector.shape_cast %24 : vector<4xf32> to vector<4x1xf32>
    %26 = arith.addf %23, %25 : vector<4x1xf32>
    %c0_26 = arith.constant 0 : index
    %c0_27 = arith.constant 0 : index
    %27 = vector.load %arg10[%c0_26, %c0_27] : memref<4x1xf32, #tpu.memory_space<vmem>>, vector<4x1xf32>
    tpu.vector_store %arg10[%c0_26, %c0_27], %26 {strides = array<i32>} : memref<4x1xf32, #tpu.memory_space<vmem>>, vector<4x1xf32>,
    %c0_i32_28 = arith.constant 0 : i32
    %28 = arith.cmpi eq, %arg1, %c0_i32_28 : i32
    %29 = arith.extui %28 : i1 to i32
    %c0_i32_29 = arith.constant 0 : i32
    %30 = arith.cmpi ne, %29, %c0_i32_29 : i32
    scf.if %30 {
      %c0_30 = arith.constant 0 : index
      %c0_31 = arith.constant 0 : index
      %c0_32 = arith.constant 0 : index
      %31 = vector.load %arg2[%c0_30, %c0_31, %c0_32] : memref<1x1x9xf32, #tpu.memory_space<vmem>>, vector<1x1x9xf32>
      %32 = vector.shape_cast %31 : vector<1x1x9xf32> to vector<1x9xf32>
      %cst_33 = arith.constant 5.120000e+02 : f32
      %33 = vector.broadcast %cst_33 : f32 to vector<1x9xf32>
      %34 = arith.subf %33, %32 : vector<1x9xf32>
      %cst_34 = arith.constant 1.000000e+00 : f32
      %35 = vector.broadcast %cst_34 : f32 to vector<1x9xf32>
      %36 = arith.addf %34, %35 : vector<1x9xf32>
      %c0_35 = arith.constant 0 : index
      %c0_36 = arith.constant 0 : index
      %37 = vector.load %arg7[%c0_35, %c0_36] : memref<4x9xf32, #tpu.memory_space<vmem>>, vector<4x9xf32>
      %c0_37 = arith.constant 0 : index
      %c0_38 = arith.constant 0 : index
      %38 = vector.load %arg8[%c0_37, %c0_38] : memref<4x9xf32, #tpu.memory_space<vmem>>, vector<4x9xf32>
      %39 = vector.broadcast %36 : vector<1x9xf32> to vector<4x9xf32>
      %40 = arith.divf %37, %39 : vector<4x9xf32>
      %c0_39 = arith.constant 0 : index
      %c0_40 = arith.constant 0 : index
      %41 = vector.load %arg9[%c0_39, %c0_40] : memref<4x1xf32, #tpu.memory_space<vmem>>, vector<4x1xf32>
      %42 = vector.broadcast %41 : vector<4x1xf32> to vector<4x9xf32>
      %43 = arith.subf %42, %37 : vector<4x9xf32>
      %44 = vector.broadcast %36 : vector<1x9xf32> to vector<4x9xf32>
      %45 = arith.divf %43, %44 : vector<4x9xf32>
      %46 = vector.broadcast %36 : vector<1x9xf32> to vector<4x9xf32>
      %47 = arith.divf %38, %46 : vector<4x9xf32>
      %c0_41 = arith.constant 0 : index
      %c0_42 = arith.constant 0 : index
      %48 = vector.load %arg10[%c0_41, %c0_42] : memref<4x1xf32, #tpu.memory_space<vmem>>, vector<4x1xf32>
      %49 = vector.broadcast %48 : vector<4x1xf32> to vector<4x9xf32>
      %50 = arith.subf %49, %38 : vector<4x9xf32>
      %51 = vector.broadcast %36 : vector<1x9xf32> to vector<4x9xf32>
      %52 = arith.divf %50, %51 : vector<4x9xf32>
      %53 = arith.mulf %40, %45 : vector<4x9xf32>
      %cst_43 = arith.constant dense<0.000000e+00> : vector<9xf32>
      %54 = vector.multi_reduction <add>, %53, %cst_43 [0] : vector<4x9xf32> to vector<9xf32>
      %55 = vector.shape_cast %54 : vector<9xf32> to vector<1x9xf32>
      %56 = arith.mulf %40, %40 : vector<4x9xf32>
      %cst_44 = arith.constant dense<0.000000e+00> : vector<9xf32>
      %57 = vector.multi_reduction <add>, %56, %cst_44 [0] : vector<4x9xf32> to vector<9xf32>
      %58 = vector.shape_cast %57 : vector<9xf32> to vector<1x9xf32>
      %59 = math.sqrt %58 : vector<1x9xf32>
      %60 = arith.mulf %45, %45 : vector<4x9xf32>
      %cst_45 = arith.constant dense<0.000000e+00> : vector<9xf32>
      %61 = vector.multi_reduction <add>, %60, %cst_45 [0] : vector<4x9xf32> to vector<9xf32>
      %62 = vector.shape_cast %61 : vector<9xf32> to vector<1x9xf32>
      %63 = math.sqrt %62 : vector<1x9xf32>
      %cst_46 = arith.constant 9.99999993E-9 : f32
      %64 = vector.broadcast %cst_46 : f32 to vector<1x9xf32>
      %65 = arith.maximumf %59, %64 : vector<1x9xf32>
      %cst_47 = arith.constant 9.99999993E-9 : f32
      %66 = vector.broadcast %cst_47 : f32 to vector<1x9xf32>
      %67 = arith.maximumf %63, %66 : vector<1x9xf32>
      %68 = arith.mulf %65, %67 : vector<1x9xf32>
      %69 = arith.divf %55, %68 : vector<1x9xf32>
      %70 = arith.mulf %47, %52 : vector<4x9xf32>
      %cst_48 = arith.constant dense<0.000000e+00> : vector<9xf32>
      %71 = vector.multi_reduction <add>, %70, %cst_48 [0] : vector<4x9xf32> to vector<9xf32>
      %72 = vector.shape_cast %71 : vector<9xf32> to vector<1x9xf32>
      %73 = arith.mulf %47, %47 : vector<4x9xf32>
      %cst_49 = arith.constant dense<0.000000e+00> : vector<9xf32>
      %74 = vector.multi_reduction <add>, %73, %cst_49 [0] : vector<4x9xf32> to vector<9xf32>
      %75 = vector.shape_cast %74 : vector<9xf32> to vector<1x9xf32>
      %76 = math.sqrt %75 : vector<1x9xf32>
      %77 = arith.mulf %52, %52 : vector<4x9xf32>
      %cst_50 = arith.constant dense<0.000000e+00> : vector<9xf32>
      %78 = vector.multi_reduction <add>, %77, %cst_50 [0] : vector<4x9xf32> to vector<9xf32>
      %79 = vector.shape_cast %78 : vector<9xf32> to vector<1x9xf32>
      %80 = math.sqrt %79 : vector<1x9xf32>
      %cst_51 = arith.constant 9.99999993E-9 : f32
      %81 = vector.broadcast %cst_51 : f32 to vector<1x9xf32>
      %82 = arith.maximumf %76, %81 : vector<1x9xf32>
      %cst_52 = arith.constant 9.99999993E-9 : f32
      %83 = vector.broadcast %cst_52 : f32 to vector<1x9xf32>
      %84 = arith.maximumf %80, %83 : vector<1x9xf32>
      %85 = arith.mulf %82, %84 : vector<1x9xf32>
      %86 = arith.divf %72, %85 : vector<1x9xf32>
      %87 = arith.subf %69, %86 : vector<1x9xf32>
      %88 = arith.mulf %87, %87 : vector<1x9xf32>
      %c0_53 = arith.constant 0 : index
      %c0_54 = arith.constant 0 : index
      %c0_55 = arith.constant 0 : index
      %89 = vector.load %arg6[%c0_53, %c0_54, %c0_55] : memref<1x1x9xf32, #tpu.memory_space<vmem>>, vector<1x1x9xf32>
      %90 = vector.shape_cast %89 : vector<1x1x9xf32> to vector<1x9xf32>
      %91 = vector.shape_cast %88 : vector<1x9xf32> to vector<1x1x9xf32>
      tpu.vector_store %arg6[%c0_53, %c0_54, %c0_55], %91 {strides = array<i32>} : memref<1x1x9xf32, #tpu.memory_space<vmem>>, vector<1x1x9xf32>,
    } else {
    }
    return
  }
  func.func @transform_0(%arg0: i32, %arg1: i32) -> (i32, i32, i32) {
    %c0_i32 = arith.constant 0 : i32
    %c0_i32_0 = arith.constant 0 : i32
    %c0_i32_1 = arith.constant 0 : i32
    return %arg0, %c0_i32, %c0_i32_0 : i32, i32, i32
  }
  func.func @transform_1(%arg0: i32, %arg1: i32) -> (i32, i32, i32) {
    %c0_i32 = arith.constant 0 : i32
    %c0_i32_0 = arith.constant 0 : i32
    return %arg0, %c0_i32, %arg1 : i32, i32, i32
  }
  func.func @transform_2(%arg0: i32, %arg1: i32) -> (i32, i32, i32) {
    %c0_i32 = arith.constant 0 : i32
    %c0_i32_0 = arith.constant 0 : i32
    return %arg0, %c0_i32, %arg1 : i32, i32, i32
  }
  func.func @transform_3(%arg0: i32, %arg1: i32) -> (i32, i32, i32) {
    %c0_i32 = arith.constant 0 : i32
    %c0_i32_0 = arith.constant 0 : i32
    return %arg0, %c0_i32, %arg1 : i32, i32, i32
  }
  func.func @transform_4(%arg0: i32, %arg1: i32) -> (i32, i32, i32) {
    %c0_i32 = arith.constant 0 : i32
    %c0_i32_0 = arith.constant 0 : i32
    %c0_i32_1 = arith.constant 0 : i32
    return %arg0, %c0_i32, %c0_i32_0 : i32, i32, i32
  }
}

</mosaic_0001>

<bundles_post_ra>
// kernel: rad_brats23_loss.1
= control target key start
LH: loop header
LB: loop body
LE: loop exit
PB: predicated region body
PF: predicated region fallthrough
CT: control target
= control target key end

     0   :  { %s1023_s15 = smov 0   ;;  %s1025_s16 = smov 0   ;;  %s1096_s0 = inlined_call_operand.vmem [shape: f32[2,1,9], index: 0, kind: input, shape index: {}]   ;;  %s1097_s1 = inlined_call_operand.vmem [shape: f32[2,4,512], index: 1, kind: input, shape index: {}]   ;;  %s1098_s2 = inlined_call_operand.vmem [shape: f32[2,4,512], index: 2, kind: input, shape index: {}]   ;;  %s1099_s3 = inlined_call_operand.vmem [shape: s8[2,9,512], index: 3, kind: input, shape index: {}]   ;;  %s1100_s4 = inlined_call_operand.vmem [shape: f32[2,1,9], index: 4, kind: output, shape index: {}]  }
   0x1   :  { %s1027_s17 = smov 0  }
   0x2 LB: > { %s26_s18 = sadd.s32 1, %s990_s16  ;;  %p898_p0 = scmp.ge.s32.totalorder %s994_s17, 1  ;;  %s994_s17 = sphi %s1027_s17, %s14_s17   ;;  %s990_s16 = sphi %s1025_s16, %s1102_s16   ;;  %s986_s15 = sphi %s1023_s15, %s1101_s15  }
   0x3   : > { %p28_p1 = scmp.ge.s32.totalorder %s26_s18, 2  ;;  %p223_p2 = scmp.lt.s32.totalorder %s994_s17, 3 }
   0x5   : > { %s1104_s18 = smov (%p28_p1, %s26_s18), 0  ;;  %p224_p3 = pnand %p898_p0, %p223_p2 }
   0x6   : > { %p272_p4 = scmp.lt.s32.totalorder (!%p224_p3), %s986_s15, 1  ;;  %vm315_vm0 = vcmask (!%p224_p3), 3072   ;;  %v996_v0 = vmov (!%p224_p3), 0.0   ;;  %vm640_vm1 = vcmask (!%p224_p3), 1043456   ;;  %v997_v45 = vmov (!%p224_p3), 0  }
   0x7   : > { %227 = sbr.rel (%p224_p3) target bundleno = 367 (0x16f), region = 36  ;;  %316 = vst.msk [vmem:[#allocation4] sm:$0xf] (!%p224_p3), %vm315_vm0, %v996_v0  ;;  %317 = vst.msk [vmem:[#allocation5] sm:$0xf] (!%p224_p3), %vm315_vm0, %v996_v0  ;;  %952 = vset.pattern.permute.xlu1 (!%p224_p3), %v997_v45  ;;  %953 = vset.pattern.permute.xlu0 (!%p224_p3), %v997_v45  ;;  %vm312_vm2 = vcmask (!%p224_p3), 68608   ;;  %v674_v60 = vlaneseq (!%p224_p3) }
   0x8   : > { %313 = vst.msk [vmem:[#allocation2] sm:$0xf] (!%p224_p3), %vm312_vm2, %v996_v0  ;;  %314 = vst.msk [vmem:[#allocation3] sm:$0xf] (!%p224_p3), %vm312_vm2, %v996_v0  ;;  %vm786_vm11 = vcmask (!%p224_p3), 65536  }
   0xe   : > { %s1106_s15 = smov (!%p272_p4, %s986_s15), 1  ;;  %v639_v46 = vld [vmem:[#allocation4] sm:$0xf]  ;;  %v653_v49 = vld [vmem:[#allocation5] sm:$0xf] }
   0xf   : > { %s907_s19 = sshll.u32 %s1106_s15, 4  ;;  %v340_v56 = vld [vmem:[#allocation2] sm:$0xf]  ;;  %s274_s5 = scalar_lea.vmem %s1096_s0, %s1106_s15 }
  0x10   : > { %s283_s22 = scalar_lea.vmem %s1097_s1, %s907_s19  ;;  %s293_s25 = scalar_lea.vmem %s1098_s2, %s907_s19  ;;  %v668_v62 = vld [vmem:[%s274_s5] sm:$0x1] }
  0x11   : > { %v318_v1 = vld [vmem:[%s283_s22] sm:$0xff]  ;;  %v319_v2 = vld [vmem:[%s283_s22 + $0x8] sm:$0xff]  ;;  %s303_s28 = scalar_lea.vmem %s1099_s3, %s907_s19  ;;  %s307_s8 = scalar_lea.vmem %s1100_s4, %s1106_s15 }
  0x12   : > { %v343_v3 = vcombine.high %v318_v1, %v318_v1  ;;  %v344_v4 = vcombine.high %v319_v2, %v319_v2  ;;  %v641_v5 = vsel %vm640_vm1, %v318_v1, 0.0  ;;  %v320_v6 = vld [vmem:[%s293_s25] sm:$0xff]  ;;  %v321_v7 = vld [vmem:[%s293_s25 + $0x8] sm:$0xff]  ;;  %v644_v14 = vsel %vm640_vm1, %v319_v2, 0.0 }
  0x13   : > { %v322_v8 = vld [vmem:[%s303_s28] sm:$0xff]  ;;  %v493_v9 = vcombine.high %v320_v6, %v320_v6  ;;  %v494_v10 = vcombine.high %v321_v7, %v321_v7  ;;  %v654_v11 = vsel %vm640_vm1, %v320_v6, 0.0  ;;  %v323_v12 = vld [vmem:[%s303_s28 + $0x8] sm:$0x55]  ;;  %v657_v19 = vsel %vm640_vm1, %v321_v7, 0.0 }
  0x14   : > { %v642_v13 = vsel %vm640_vm1, %v343_v3, 0.0  ;;  %v325_v15 = vunpack.c.1.s8 %v322_v8  ;;  %411 = vmatprep.mubr.f32.mxu0 %v343_v3  ;;  %481 = vmatprep.mubr.f32.mxu1 %v344_v4  ;;  %v646_v17 = vsel %vm640_vm1, %v344_v4, 0.0  ;;  %v329_v21 = vunpack.c.1.s8 %v323_v12  ;;  %v490_v3 = vld [vmem:[#allocation3] sm:$0xf] }
  0x15   : > { %v643_v16 = vadd.f32 %v642_v13, %v641_v5  ;;  %v655_v18 = vsel %vm640_vm1, %v493_v9, 0.0  ;;  %v327_v23 = vunpack.c.3.s8 %v322_v8  ;;  %v659_v25 = vsel %vm640_vm1, %v494_v10, 0.0 }
  0x16   : > { %v656_v20 = vadd.f32 %v655_v18, %v654_v11  ;;  %v333_v22 = vcvt.s32.f32 %v325_v15  ;;  %v331_v26 = vunpack.c.3.s8 %v323_v12  ;;  %v324_v27 = vunpack.c.0.s8 %v322_v8 }
  0x17   : > { %v645_v24 = vadd.f32 %v644_v14, %v643_v16  ;;  %v337_v29 = vcvt.s32.f32 %v329_v21  ;;  %v335_v30 = vcvt.s32.f32 %v327_v23  ;;  %v328_v31 = vunpack.c.0.s8 %v323_v12 }
  0x18   : > { %v658_v28 = vadd.f32 %v657_v19, %v656_v20  ;;  %v339_v33 = vcvt.s32.f32 %v331_v26  ;;  %v332_v34 = vcvt.s32.f32 %v324_v27  ;;  %v326_v37 = vunpack.c.2.s8 %v322_v8 }
  0x19   : > { %v647_v32 = vadd.f32 %v646_v17, %v645_v24  ;;  %v910_v35 = vpack.c.bf16 %v337_v29, %v333_v22  ;;  %v336_v36 = vcvt.s32.f32 %v328_v31  ;;  %v330_v40 = vunpack.c.2.s8 %v323_v12 }
  0x1a   : > { %v660_v38 = vadd.f32 %v659_v25, %v658_v28  ;;  %v914_v39 = vpack.c.bf16 %v339_v33, %v335_v30  ;;  %v334_v42 = vcvt.s32.f32 %v326_v37 }
  0x1b   : > { %648 = vadd.xlane.f32.xlu0 %v647_v32  ;;  %911 = vmatprep.subr.bf16.mxu0 %v910_v35  ;;  %v912_v41 = vpack.c.bf16 %v336_v36, %v332_v34  ;;  %v338_v43 = vcvt.s32.f32 %v330_v40 }
  0x1c   : > { %915 = vmatprep.subr.bf16.mxu1 %v914_v39 }
  0x1d   : > { %913 = vmatpush1.bf16.xpose.msra.mxu0 %v912_v41  ;;  %v916_v44 = vpack.c.bf16 %v338_v43, %v334_v42 }
  0x1e   : > { %919 = vmatprep.subr.bf16.mxu0 %v910_v35 }
  0x1f   : > { %661 = vadd.xlane.f32.xlu0 %v660_v38  ;;  %917 = vmatpush1.bf16.xpose.msra.mxu1 %v916_v44 }
  0x20   : > { %923 = vmatprep.subr.bf16.mxu1 %v914_v39 }
  0x24   : > { %412 = vmatmul.mubr.f32.vlgmr.msra.gmra.mrb[0].mxu0 %v318_v1  ;;  %v675_v1 = vshrl.u32 %v674_v60, 7 }
  0x25   : > { %921 = vmatpush1.bf16.xpose.msra.mxu0 %v912_v41  ;;  %561 = vmatprep.mubr.f32.mxu0 %v493_v9 }
  0x26   : > { %482 = vmatmul.mubr.f32.vlgmr.msra.gmra.mrb[0].mxu1 %v319_v2  ;;  %v669_v2 = vsub.f32 512.0, %v668_v62 }
  0x27   : > { %925 = vmatpush1.bf16.xpose.msra.mxu1 %v916_v44  ;;  %631 = vmatprep.mubr.f32.mxu1 %v494_v10 }
  0x28   : > { %v670_v8 = vadd.f32 1.0, %v669_v2 }
  0x2c   : > { %562 = vmatmul.mubr.f32.vlgmr.msra.gmra.mrb[2].mxu0 %v320_v6 }
  0x2e   : > { %632 = vmatmul.mubr.f32.vlgmr.msra.gmra.mrb[2].mxu1 %v321_v7  ;;  %v676_v7 = vsub.s32 0, %v675_v1 }
  0x30   : > { %v677_v10 = vrot.slane %v670_v8, %v676_v7 }
  0x32   : > { %958 = vrcp.f32 %v677_v10 }
  0x3c   : > { %v959_v11 = vpop.eup %958 }
  0xa8   : > { %v649_v47 = vpop.xlane.xlu0 %648 }
  0xa9   : > { %v650_v48 = vadd.f32 %v649_v47, %v639_v46 }
  0xab   : > { %652 = vst.msk [vmem:[#allocation4] sm:$0xf] %vm315_vm0, %v650_v48 }
  0xac   : > { %v662_v50 = vpop.xlane.xlu0 %661 }
  0xad   : > { %v663_v51 = vadd.f32 %v662_v50, %v653_v49 }
  0xaf   : > { %664 = vst.msk [vmem:[#allocation5] sm:$0xf] %vm315_vm0, %v663_v51 }
  0xb2   : > { %v681_v52 = vld [vmem:[#allocation4] sm:$0xf] }
  0xb3   : > { %684 = vperm.xlu1 %952, %v681_v52  }
  0xb6   : > { %v690_v53 = vld [vmem:[#allocation5] sm:$0xf] }
  0xb7   : > { %693 = vperm.xlu1 %952, %v690_v53  }
  0xf7   : > { %v413_v54 = vpop.f32.mrb[0].mxu0 }
  0xf8   : > { %v415_v55 = vpop.f32.mrb[1].mxu0 }
  0xf9   : > { %v483_v57 = vpop.f32.mrb[0].mxu1 }
  0xfa   : > { %v484_v58 = vadd.f32 %v483_v57, %v413_v54  ;;  %v485_v59 = vpop.f32.mrb[1].mxu1 }
  0xfc   : > { %v487_v61 = vadd.f32 %v484_v58, %v340_v56 }
  0xfe   : > { %489 = vst.msk [vmem:[#allocation2] sm:$0xf] %vm312_vm2, %v487_v61 }
  0xff   : > { %v563_v63 = vpop.f32.mrb[2].mxu0 }
 0x100   : > { %v565_v0 = vpop.f32.mrb[3].mxu0 }
 0x101   : > { %v633_v4 = vpop.f32.mrb[2].mxu1 }
 0x102   : > { %v634_v5 = vadd.f32 %v633_v4, %v563_v63  ;;  %v635_v6 = vpop.f32.mrb[3].mxu1 }
 0x104   : > { %v637_v9 = vadd.f32 %v634_v5, %v490_v3 }
 0x105   : > { %v671_v12 = vld [vmem:[#allocation2] sm:$0xf] }
 0x106   : > { %638 = vst.msk [vmem:[#allocation3] sm:$0xf] %vm312_vm2, %v637_v9  ;;  %v680_v13 = vmul.f32 %v959_v11, %v671_v12 }
 0x108   : > { %v706_v16 = vmul.f32 %v680_v13, %v680_v13 }
 0x10a   : > { %v707_v18 = vsel %vm312_vm2, %v706_v16, 0.0 }
 0x10b   : > { %v708_v19 = vrot.slane %v707_v18, 4 }
 0x10d   : > { %v672_v14 = vld [vmem:[#allocation3] sm:$0xf]  ;;  %v709_v22 = vadd.f32 %v708_v19, %v707_v18 }
 0x10e   : > { %v689_v15 = vmul.f32 %v959_v11, %v672_v14 }
 0x10f   : > { %v710_v24 = vrot.slane %v709_v22, 2 }
 0x110   : > { %v749_v17 = vmul.f32 %v689_v15, %v689_v15 }
 0x111   : > { %v711_v27 = vadd.f32 %v710_v24, %v709_v22 }
 0x112   : > { %v750_v20 = vsel %vm312_vm2, %v749_v17, 0.0 }
 0x113   : > { %v751_v21 = vrot.slane %v750_v20, 4  ;;  %v712_v31 = vrot.slane %v711_v27, 1 }
 0x115   : > { %v752_v23 = vadd.f32 %v751_v21, %v750_v20  ;;  %v713_v38 = vadd.f32 %v712_v31, %v711_v27 }
 0x117   : > { %v753_v25 = vrot.slane %v752_v23, 2  ;;  %960 = vrsqrt.f32 %v713_v38  ;;  %vm716_vm3 = vcmp.eq.f32.partialorder %v713_v38, inf  ;;  %v719_v59 = vand.u32 2147483648, %v713_v38 }
 0x118   : > { %vm718_vm4 = vcmp.eq.f32.partialorder %v713_v38, 0.0 }
 0x119   : > { %v754_v30 = vadd.f32 %v753_v25, %v752_v23 }
 0x11b   : > { %v755_v37 = vrot.slane %v754_v30, 1 }
 0x11d   : > { %v756_v42 = vadd.f32 %v755_v37, %v754_v30 }
 0x11f   : > { %962 = vrsqrt.f32 %v756_v42  ;;  %vm759_vm5 = vcmp.eq.f32.partialorder %v756_v42, inf  ;;  %vm761_vm6 = vcmp.eq.f32.partialorder %v756_v42, 0.0  ;;  %v762_v2 = vand.u32 2147483648, %v756_v42 }
 0x121   : > { %v961_v53 = vpop.eup %960 }
 0x122   : > { %v715_v56 = vmul.f32 %v961_v53, %v713_v38 }
 0x124   : > { %v717_v61 = vsel %vm716_vm3, %v713_v38, %v715_v56 }
 0x125   : > { %v720_v3 = vsel %vm718_vm4, %v719_v59, %v717_v61 }
 0x129   : > { %v963_v55 = vpop.eup %962 }
 0x12a   : > { %v758_v60 = vmul.f32 %v963_v55, %v756_v42 }
 0x12c   : > { %v760_v5 = vsel %vm759_vm5, %v756_v42, %v758_v60 }
 0x132   : > { %v685_v26 = vpop.permute.xlu1 %684 }
 0x133   : > { %v687_v28 = vsub.f32 %v685_v26, %v671_v12  ;;  %v736_v12 = vmax.f32 %v720_v3, 1e-08 }
 0x135   : > { %v688_v29 = vmul.f32 %v959_v11, %v687_v28 }
 0x136   : > { %v694_v32 = vpop.permute.xlu1 %693 }
 0x137   : > { %v721_v33 = vmul.f32 %v688_v29, %v688_v29  ;;  %v696_v34 = vsub.f32 %v694_v32, %v672_v14  ;;  %v698_v57 = vmul.f32 %v688_v29, %v680_v13  ;;  %v763_v13 = vsel %vm761_vm6, %v762_v2, %v760_v5 }
 0x138   : > { %v779_v21 = vmax.f32 %v763_v13, 1e-08 }
 0x139   : > { %v722_v35 = vsel %vm312_vm2, %v721_v33, 0.0  ;;  %v697_v36 = vmul.f32 %v959_v11, %v696_v34  ;;  %v699_v63 = vsel %vm312_vm2, %v698_v57, 0.0 }
 0x13a   : > { %v723_v39 = vrot.slane %v722_v35, 4  ;;  %v700_v6 = vrot.slane %v699_v63, 4 }
 0x13b   : > { %v764_v40 = vmul.f32 %v697_v36, %v697_v36  ;;  %v741_v58 = vmul.f32 %v697_v36, %v689_v15 }
 0x13c   : > { %v724_v41 = vadd.f32 %v723_v39, %v722_v35  ;;  %v701_v15 = vadd.f32 %v700_v6, %v699_v63 }
 0x13d   : > { %v765_v43 = vsel %vm312_vm2, %v764_v40, 0.0  ;;  %v742_v0 = vsel %vm312_vm2, %v741_v58, 0.0 }
 0x13e   : > { %v725_v44 = vrot.slane %v724_v41, 2  ;;  %v766_v45 = vrot.slane %v765_v43, 4  ;;  %v743_v8 = vrot.slane %v742_v0, 4  ;;  %v702_v23 = vrot.slane %v701_v15, 2 }
 0x140   : > { %v726_v46 = vadd.f32 %v725_v44, %v724_v41  ;;  %v767_v47 = vadd.f32 %v766_v45, %v765_v43  ;;  %v744_v16 = vadd.f32 %v743_v8, %v742_v0  ;;  %v703_v26 = vadd.f32 %v702_v23, %v701_v15 }
 0x142   : > { %v727_v48 = vrot.slane %v726_v46, 1  ;;  %v768_v49 = vrot.slane %v767_v47, 2  ;;  %v745_v24 = vrot.slane %v744_v16, 2  ;;  %v704_v28 = vrot.slane %v703_v26, 1 }
 0x144   : > { %v728_v50 = vadd.f32 %v727_v48, %v726_v46  ;;  %v769_v51 = vadd.f32 %v768_v49, %v767_v47  ;;  %v746_v27 = vadd.f32 %v745_v24, %v744_v16  ;;  %v705_v31 = vadd.f32 %v704_v28, %v703_v26 }
 0x146   : > { %964 = vrsqrt.f32 %v728_v50  ;;  %v770_v52 = vrot.slane %v769_v51, 1  ;;  %vm731_vm7 = vcmp.eq.f32.partialorder %v728_v50, inf  ;;  %v734_v4 = vand.u32 2147483648, %v728_v50 }
 0x147   : > { %vm733_vm8 = vcmp.eq.f32.partialorder %v728_v50, 0.0  ;;  %v747_v29 = vrot.slane %v746_v27, 1 }
 0x148   : > { %v771_v54 = vadd.f32 %v770_v52, %v769_v51 }
 0x149   : > { %v748_v32 = vadd.f32 %v747_v29, %v746_v27 }
 0x14a   : > { %966 = vrsqrt.f32 %v771_v54  ;;  %vm774_vm9 = vcmp.eq.f32.partialorder %v771_v54, inf  ;;  %v777_v17 = vand.u32 2147483648, %v771_v54  ;;  %vm776_vm10 = vcmp.eq.f32.partialorder %v771_v54, 0.0 }
 0x150   : > { %v965_v62 = vpop.eup %964 }
 0x151   : > { %v730_v1 = vmul.f32 %v965_v62, %v728_v50 }
 0x153   : > { %v732_v7 = vsel %vm731_vm7, %v728_v50, %v730_v1 }
 0x154   : > { %v735_v9 = vsel %vm733_vm8, %v734_v4, %v732_v7  ;;  %v967_v10 = vpop.eup %966 }
 0x155   : > { %v737_v11 = vmax.f32 %v735_v9, 1e-08  ;;  %v773_v14 = vmul.f32 %v967_v10, %v771_v54 }
 0x157   : > { %v738_v18 = vmul.f32 %v737_v11, %v736_v12  ;;  %v775_v19 = vsel %vm774_vm9, %v771_v54, %v773_v14 }
 0x158   : > { %v778_v20 = vsel %vm776_vm10, %v777_v17, %v775_v19 }
 0x159   : > { %v780_v22 = vmax.f32 %v778_v20, 1e-08  ;;  %968 = vrcp.f32 %v738_v18 }
 0x15b   : > { %v781_v25 = vmul.f32 %v780_v22, %v779_v21 }
 0x15d   : > { %970 = vrcp.f32 %v781_v25 }
 0x163   : > { %v969_v30 = vpop.eup %968 }
 0x164   : > { %v740_v34 = vmul.f32 %v969_v30, %v705_v31 }
 0x167   : > { %v971_v33 = vpop.eup %970 }
 0x168   : > { %v783_v35 = vmul.f32 %v971_v33, %v748_v32 }
 0x16a   : > { %v784_v36 = vsub.f32 %v740_v34, %v783_v35 }
 0x16c   : > { %v785_v37 = vmul.f32 %v784_v36, %v784_v36 }
 0x16e   : > { %787 = vst.msk [vmem:[%s307_s8] sm:$0x1] %vm786_vm11, %v785_v37 }
 0x16f PF: > { %s14_s17 = sadd.s32 1, %s994_s17   ;;  %s1101_s15 = smov %s990_s16 }
 0x170   : > { %p11_p5 = scmp.ge.s32.totalorder %s14_s17, 4   ;;  %s1102_s16 = smov %s1104_s18 }
 0x172   :  { %13 = sbr.rel (!%p11_p5) target bundleno = 2 (0x2), region = 83 }

</bundles_post_ra>
